<compile_context>
chip_gen: v7x
topology: tpu7x:2x2x1
jax: 0.10.0
libtpu: 0.0.40
codegen_flags: <defaults>
</compile_context>

<pallas_src>
import jax
import jax.numpy as jnp
from jax.experimental import pallas as pl
from jax.experimental.pallas import tpu as pltpu

HID = 32          # hidden width of every encoder (fixed by the module)
LANE_PAD = 128    # lane-dense output width for the mean head


def _round_up(x, m):
    return (x + m - 1) // m * m


def _make_actor_kernel(n_obs):
    """Builds the fused forward kernel for `n_obs` observation types."""

    def kernel(*refs):
        obs_refs = refs[:n_obs]                     # each (TB, d_i) f32
        slab_refs = refs[n_obs:2 * n_obs]           # each (d_i, n*32) bf16
        (bcat_ref,                                  # (1, n*32) f32
         wf_ref,                                    # (n*32, 32) bf16
         bf_ref,                                    # (1, 32) f32
         wm_ref,                                    # (32, 128) bf16 (lane-padded)
         bm_ref,                                    # (1, 128) f32  (lane-padded)
         mean_ref) = refs[2 * n_obs:]               # (TB, 128) bf16 output

        # Per-observation encoders.  sum_i obs_i @ slab_i == concat(obs) @
        # block_diag(w_i): same MXU work, no in-kernel concatenate needed.
        acc = jnp.dot(obs_refs[0][...].astype(jnp.bfloat16), slab_refs[0][...],
                      preferred_element_type=jnp.float32)
        for i in range(1, n_obs):
            acc = acc + jnp.dot(obs_refs[i][...].astype(jnp.bfloat16),
                                slab_refs[i][...],
                                preferred_element_type=jnp.float32)
        # bf16 tanh: operands were headed to bf16 for the next MXU push anyway.
        enc = jnp.tanh((acc + bcat_ref[...]).astype(jnp.bfloat16))

        # Final encoder.
        h = jnp.tanh((jnp.dot(enc, wf_ref[...],
                              preferred_element_type=jnp.float32)
                      + bf_ref[...]).astype(jnp.bfloat16))

        # Mean head (lane-padded, bf16 store halves the dominant writeback).
        mean = (jnp.dot(h, wm_ref[...], preferred_element_type=jnp.float32)
                + bm_ref[...])
        mean_ref[...] = mean.astype(mean_ref.dtype)

    return kernel


def _tiling(batch, block_b):
    """Pick (tile_rows, padded_batch)."""
    if batch <= 32:
        # One tile whose block shape equals the full array dims: no padding,
        # no (8,128) divisibility requirement on the batch dim.
        return batch, batch
    # >=2 tiles so dimension_semantics=("parallel",) can use both v7x
    # TensorCores; tile is a multiple of 16 (bf16 sublane packing) chosen to
    # minimize batch padding; at most ~block_b rows per tile.
    n_tiles = max(2, -(-batch // block_b))
    tb = _round_up(-(-batch // n_tiles), 16)
    return tb, _round_up(batch, tb)


def actor_forward(observations, params, *, block_b=1024):
    """observations: list of (B, d_i) float32 arrays. Returns (mean, std)."""
    B = observations[0].shape[0]
    act_dim = params["log_std"].shape[1]
    n = len(observations)
    obs_dims = [o.shape[1] for o in observations]
    n_hid = n * HID

    tb, b_pad = _tiling(B, block_b)
    if b_pad != B:
        # Rare path (only when B > 32 and not a tile multiple); padded rows
        # flow through tanh(bias) and are sliced off below.
        observations = [jnp.pad(o, ((0, b_pad - B), (0, 0)))
                        for o in observations]

    in_specs = (
        [pl.BlockSpec((tb, d), lambda i: (i, 0)) for d in obs_dims] +     # obs
        [pl.BlockSpec((d, n_hid), lambda i: (0, 0)) for d in obs_dims] +  # slabs
        [pl.BlockSpec((1, n_hid), lambda i: (0, 0)),                      # b_cat
         pl.BlockSpec((n_hid, HID), lambda i: (0, 0)),                    # wf
         pl.BlockSpec((1, HID), lambda i: (0, 0)),                        # bf
         pl.BlockSpec((HID, LANE_PAD), lambda i: (0, 0)),                 # wm
         pl.BlockSpec((1, LANE_PAD), lambda i: (0, 0))])                  # bm

    mean_padded = pl.pallas_call(
        _make_actor_kernel(n),
        out_shape=jax.ShapeDtypeStruct((b_pad, LANE_PAD), jnp.bfloat16),
        grid_spec=pl.GridSpec(
            grid=(b_pad // tb,),
            in_specs=in_specs,
            out_specs=pl.BlockSpec((tb, LANE_PAD), lambda i: (i, 0)),
        ),
        compiler_params=pltpu.CompilerParams(
            dimension_semantics=("parallel",)),
    )(*observations, *params["w_slabs_bf16"],
      params["b_cat"], params["wf_bf16"], params["bf"],
      params["wm_pad_bf16"], params["bm_pad"])

    mean = mean_padded[:B, :act_dim].astype(jnp.float32)
    # Batch-independent: keep out of the kernel.
    std = jnp.exp(params["log_std"])
    return mean, std


def init_actor_params(key, obs_dim, act_dim):
    """Deterministic synthetic params matching Actor(obs_dim, act_dim) shapes.

    Keeps f32 per-layer params (for the reference) and pre-packs the
    kernel-facing forms: per-obs weight slabs (row-split of the block-diagonal
    matrix), concatenated bias, bf16-cast matmul operands, lane-padded head.
    """
    n = len(obs_dim)
    keys = jax.random.split(key, 2 * n + 4)
    w, b = [], []
    for i, d in enumerate(obs_dim):
        w.append(jax.random.normal(keys[2 * i], (d, HID), jnp.float32) * 0.1)
        b.append(jax.random.normal(keys[2 * i + 1], (1, HID), jnp.float32) * 0.1)
    k = 2 * n
    wf = jax.random.normal(keys[k], (n * HID, HID), jnp.float32) * 0.1
    bf = jax.random.normal(keys[k + 1], (1, HID), jnp.float32) * 0.1
    wm = jax.random.normal(keys[k + 2], (HID, act_dim), jnp.float32) * 0.1
    bm = jax.random.normal(keys[k + 3], (1, act_dim), jnp.float32) * 0.1

    # Per-obs slabs: slab_i is the d_i-row slice of the block-diagonal encoder
    # weight (nonzero only in columns [i*32:(i+1)*32]).
    w_slabs = []
    for i, wi in enumerate(w):
        slab = jnp.zeros((obs_dim[i], n * HID), jnp.float32)
        slab = slab.at[:, i * HID:(i + 1) * HID].set(wi)
        w_slabs.append(slab.astype(jnp.bfloat16))
    b_cat = jnp.concatenate(b, axis=-1)                   # (1, n*32)

    # Lane-dense mean head: pad output lanes to 128 with zeros.
    wm_pad = jnp.zeros((HID, LANE_PAD), jnp.float32).at[:, :act_dim].set(wm)
    bm_pad = jnp.zeros((1, LANE_PAD), jnp.float32).at[:, :act_dim].set(bm)

    params = {
        # f32 originals (reference / training-side view)
        "w": w, "b": b, "wf": wf, "bf": bf, "wm": wm, "bm": bm,
        # std_layer is initialized to zeros in the module -> std = 1.
        "log_std": jnp.zeros((1, act_dim), jnp.float32),
        # packed kernel-facing params (matmul operands pre-cast to bf16)
        "w_slabs_bf16": w_slabs,
        "b_cat": b_cat,
        "wf_bf16": wf.astype(jnp.bfloat16),
        "wm_pad_bf16": wm_pad.astype(jnp.bfloat16),
        "bm_pad": bm_pad,
    }
    return params


def actor_forward_ref(observations, params):
    """Pure-JAX f32 reference mirroring the PyTorch forward."""
    encs = []
    for obs, w, b in zip(observations, params["w"], params["b"]):
        encs.append(jnp.tanh(obs @ w + b))
    cat = jnp.concatenate(encs, axis=-1)
    h = jnp.tanh(cat @ params["wf"] + params["bf"])
    mean = h @ params["wm"] + params["bm"]
    std = jnp.exp(params["log_std"])
    return mean, std


if __name__ == "__main__":
    key = jax.random.PRNGKey(0)
    obs_dim = [8, 12, 16]   # three observation types
    act_dim = 6
    batch = 4

    pkey, *okeys = jax.random.split(key, 1 + len(obs_dim))
    params = init_actor_params(pkey, obs_dim, act_dim)
    observations = [
        jax.random.normal(okeys[i], (batch, d), jnp.float32)
        for i, d in enumerate(obs_dim)
    ]

    mean, std = actor_forward(observations, params)
    jax.block_until_ready((mean, std))

    mean_ref, std_ref = actor_forward_ref(observations, params)
    assert mean.shape == (batch, act_dim) and std.shape == (1, act_dim)
    # Matmuls/activations run in bf16 on the MXU/VPU -> bf16 tolerance.
    assert jnp.allclose(mean, mean_ref, atol=2e-2, rtol=2e-2)
    assert jnp.allclose(std, std_ref, atol=1e-6, rtol=1e-6)

    print("KERNEL_OK")
</pallas_src>

<mosaic_0001>
module attributes {stable_mosaic.version = 11 : i64} {
  func.func @kernel(%arg0: i32, %arg1: memref<4x8xf32, #tpu.memory_space<vmem>>, %arg2: memref<4x12xf32, #tpu.memory_space<vmem>>, %arg3: memref<4x16xf32, #tpu.memory_space<vmem>>, %arg4: memref<8x96xbf16, #tpu.memory_space<vmem>>, %arg5: memref<12x96xbf16, #tpu.memory_space<vmem>>, %arg6: memref<16x96xbf16, #tpu.memory_space<vmem>>, %arg7: memref<1x96xf32, #tpu.memory_space<vmem>>, %arg8: memref<96x32xbf16, #tpu.memory_space<vmem>>, %arg9: memref<1x32xf32, #tpu.memory_space<vmem>>, %arg10: memref<32x128xbf16, #tpu.memory_space<vmem>>, %arg11: memref<1x128xf32, #tpu.memory_space<vmem>>, %arg12: memref<4x128xbf16, #tpu.memory_space<vmem>>) attributes {dimension_semantics = [#tpu.dimension_semantics<parallel>], iteration_bounds = array<i64: 1>, scalar_prefetch = 0 : i64, scratch_operands = 0 : i64, tpu.core_type = #tpu.core_type<tc>, window_params = [{transform_indices = @transform_0, window_bounds = array<i64: 4, 8>}, {transform_indices = @transform_1, window_bounds = array<i64: 4, 12>}, {transform_indices = @transform_2, window_bounds = array<i64: 4, 16>}, {pipeline_mode = #tpu.pipeline_mode<synchronous>, transform_indices = @transform_3, window_bounds = array<i64: 8, 96>}, {pipeline_mode = #tpu.pipeline_mode<synchronous>, transform_indices = @transform_4, window_bounds = array<i64: 12, 96>}, {pipeline_mode = #tpu.pipeline_mode<synchronous>, transform_indices = @transform_5, window_bounds = array<i64: 16, 96>}, {pipeline_mode = #tpu.pipeline_mode<synchronous>, transform_indices = @transform_6, window_bounds = array<i64: 1, 96>}, {pipeline_mode = #tpu.pipeline_mode<synchronous>, transform_indices = @transform_7, window_bounds = array<i64: 96, 32>}, {pipeline_mode = #tpu.pipeline_mode<synchronous>, transform_indices = @transform_8, window_bounds = array<i64: 1, 32>}, {pipeline_mode = #tpu.pipeline_mode<synchronous>, transform_indices = @transform_9, window_bounds = array<i64: 32, 128>}, {pipeline_mode = #tpu.pipeline_mode<synchronous>, transform_indices = @transform_10, window_bounds = array<i64: 1, 128>}, {transform_indices = @transform_11, window_bounds = array<i64: 4, 128>}]} {
    %c0 = arith.constant 0 : index
    %c0_0 = arith.constant 0 : index
    %0 = vector.load %arg1[%c0, %c0_0] : memref<4x8xf32, #tpu.memory_space<vmem>>, vector<4x8xf32>
    %1 = arith.truncf %0 : vector<4x8xf32> to vector<4x8xbf16>
    %c0_1 = arith.constant 0 : index
    %c0_2 = arith.constant 0 : index
    %2 = vector.load %arg4[%c0_1, %c0_2] : memref<8x96xbf16, #tpu.memory_space<vmem>>, vector<8x96xbf16>
    %cst = arith.constant dense<0.000000e+00> : vector<4x96xf32>
    %3 = tpu.matmul %1, %2, %cst {dimension_numbers = #tpu.dot_dimension_numbers<[1], [0], [0], [1], [0, 0, 1, 1], [], []>} : vector<4x8xbf16>, vector<8x96xbf16>, vector<4x96xf32> -> vector<4x96xf32>
    %c0_3 = arith.constant 0 : index
    %c0_4 = arith.constant 0 : index
    %4 = vector.load %arg2[%c0_3, %c0_4] : memref<4x12xf32, #tpu.memory_space<vmem>>, vector<4x12xf32>
    %5 = arith.truncf %4 : vector<4x12xf32> to vector<4x12xbf16>
    %c0_5 = arith.constant 0 : index
    %c0_6 = arith.constant 0 : index
    %6 = vector.load %arg5[%c0_5, %c0_6] : memref<12x96xbf16, #tpu.memory_space<vmem>>, vector<12x96xbf16>
    %cst_7 = arith.constant dense<0.000000e+00> : vector<4x96xf32>
    %7 = tpu.matmul %5, %6, %cst_7 {dimension_numbers = #tpu.dot_dimension_numbers<[1], [0], [0], [1], [0, 0, 1, 1], [], []>} : vector<4x12xbf16>, vector<12x96xbf16>, vector<4x96xf32> -> vector<4x96xf32>
    %8 = arith.addf %3, %7 : vector<4x96xf32>
    %c0_8 = arith.constant 0 : index
    %c0_9 = arith.constant 0 : index
    %9 = vector.load %arg3[%c0_8, %c0_9] : memref<4x16xf32, #tpu.memory_space<vmem>>, vector<4x16xf32>
    %10 = arith.truncf %9 : vector<4x16xf32> to vector<4x16xbf16>
    %c0_10 = arith.constant 0 : index
    %c0_11 = arith.constant 0 : index
    %11 = vector.load %arg6[%c0_10, %c0_11] : memref<16x96xbf16, #tpu.memory_space<vmem>>, vector<16x96xbf16>
    %cst_12 = arith.constant dense<0.000000e+00> : vector<4x96xf32>
    %12 = tpu.matmul %10, %11, %cst_12 {dimension_numbers = #tpu.dot_dimension_numbers<[1], [0], [0], [1], [0, 0, 1, 1], [], []>} : vector<4x16xbf16>, vector<16x96xbf16>, vector<4x96xf32> -> vector<4x96xf32>
    %13 = arith.addf %8, %12 : vector<4x96xf32>
    %c0_13 = arith.constant 0 : index
    %c0_14 = arith.constant 0 : index
    %14 = vector.load %arg7[%c0_13, %c0_14] : memref<1x96xf32, #tpu.memory_space<vmem>>, vector<1x96xf32>
    %15 = vector.broadcast %14 : vector<1x96xf32> to vector<4x96xf32>
    %16 = arith.addf %13, %15 : vector<4x96xf32>
    %17 = arith.truncf %16 : vector<4x96xf32> to vector<4x96xbf16>
    %18 = math.tanh %17 : vector<4x96xbf16>
    %c0_15 = arith.constant 0 : index
    %c0_16 = arith.constant 0 : index
    %19 = vector.load %arg8[%c0_15, %c0_16] : memref<96x32xbf16, #tpu.memory_space<vmem>>, vector<96x32xbf16>
    %cst_17 = arith.constant dense<0.000000e+00> : vector<4x32xf32>
    %20 = tpu.matmul %18, %19, %cst_17 {dimension_numbers = #tpu.dot_dimension_numbers<[1], [0], [0], [1], [0, 0, 1, 1], [], []>} : vector<4x96xbf16>, vector<96x32xbf16>, vector<4x32xf32> -> vector<4x32xf32>
    %c0_18 = arith.constant 0 : index
    %c0_19 = arith.constant 0 : index
    %21 = vector.load %arg9[%c0_18, %c0_19] : memref<1x32xf32, #tpu.memory_space<vmem>>, vector<1x32xf32>
    %22 = vector.broadcast %21 : vector<1x32xf32> to vector<4x32xf32>
    %23 = arith.addf %20, %22 : vector<4x32xf32>
    %24 = arith.truncf %23 : vector<4x32xf32> to vector<4x32xbf16>
    %25 = math.tanh %24 : vector<4x32xbf16>
    %c0_20 = arith.constant 0 : index
    %c0_21 = arith.constant 0 : index
    %26 = vector.load %arg10[%c0_20, %c0_21] : memref<32x128xbf16, #tpu.memory_space<vmem>>, vector<32x128xbf16>
    %cst_22 = arith.constant dense<0.000000e+00> : vector<4x128xf32>
    %27 = tpu.matmul %25, %26, %cst_22 {dimension_numbers = #tpu.dot_dimension_numbers<[1], [0], [0], [1], [0, 0, 1, 1], [], []>} : vector<4x32xbf16>, vector<32x128xbf16>, vector<4x128xf32> -> vector<4x128xf32>
    %c0_23 = arith.constant 0 : index
    %c0_24 = arith.constant 0 : index
    %28 = vector.load %arg11[%c0_23, %c0_24] : memref<1x128xf32, #tpu.memory_space<vmem>>, vector<1x128xf32>
    %29 = vector.broadcast %28 : vector<1x128xf32> to vector<4x128xf32>
    %30 = arith.addf %27, %29 : vector<4x128xf32>
    %31 = arith.truncf %30 : vector<4x128xf32> to vector<4x128xbf16>
    %c0_25 = arith.constant 0 : index
    %c0_26 = arith.constant 0 : index
    %32 = vector.load %arg12[%c0_25, %c0_26] : memref<4x128xbf16, #tpu.memory_space<vmem>>, vector<4x128xbf16>
    tpu.vector_store %arg12[%c0_25, %c0_26], %31 {strides = array<i32>} : memref<4x128xbf16, #tpu.memory_space<vmem>>, vector<4x128xbf16>,
    return
  }
  func.func @transform_0(%arg0: i32) -> (i32, i32) {
    %c0_i32 = arith.constant 0 : i32
    %c0_i32_0 = arith.constant 0 : i32
    return %arg0, %c0_i32 : i32, i32
  }
  func.func @transform_1(%arg0: i32) -> (i32, i32) {
    %c0_i32 = arith.constant 0 : i32
    %c0_i32_0 = arith.constant 0 : i32
    return %arg0, %c0_i32 : i32, i32
  }
  func.func @transform_2(%arg0: i32) -> (i32, i32) {
    %c0_i32 = arith.constant 0 : i32
    %c0_i32_0 = arith.constant 0 : i32
    return %arg0, %c0_i32 : i32, i32
  }
  func.func @transform_3(%arg0: i32) -> (i32, i32) {
    %c0_i32 = arith.constant 0 : i32
    %c0_i32_0 = arith.constant 0 : i32
    %c0_i32_1 = arith.constant 0 : i32
    return %c0_i32, %c0_i32_0 : i32, i32
  }
  func.func @transform_4(%arg0: i32) -> (i32, i32) {
    %c0_i32 = arith.constant 0 : i32
    %c0_i32_0 = arith.constant 0 : i32
    %c0_i32_1 = arith.constant 0 : i32
    return %c0_i32, %c0_i32_0 : i32, i32
  }
  func.func @transform_5(%arg0: i32) -> (i32, i32) {
    %c0_i32 = arith.constant 0 : i32
    %c0_i32_0 = arith.constant 0 : i32
    %c0_i32_1 = arith.constant 0 : i32
    return %c0_i32, %c0_i32_0 : i32, i32
  }
  func.func @transform_6(%arg0: i32) -> (i32, i32) {
    %c0_i32 = arith.constant 0 : i32
    %c0_i32_0 = arith.constant 0 : i32
    %c0_i32_1 = arith.constant 0 : i32
    return %c0_i32, %c0_i32_0 : i32, i32
  }
  func.func @transform_7(%arg0: i32) -> (i32, i32) {
    %c0_i32 = arith.constant 0 : i32
    %c0_i32_0 = arith.constant 0 : i32
    %c0_i32_1 = arith.constant 0 : i32
    return %c0_i32, %c0_i32_0 : i32, i32
  }
  func.func @transform_8(%arg0: i32) -> (i32, i32) {
    %c0_i32 = arith.constant 0 : i32
    %c0_i32_0 = arith.constant 0 : i32
    %c0_i32_1 = arith.constant 0 : i32
    return %c0_i32, %c0_i32_0 : i32, i32
  }
  func.func @transform_9(%arg0: i32) -> (i32, i32) {
    %c0_i32 = arith.constant 0 : i32
    %c0_i32_0 = arith.constant 0 : i32
    %c0_i32_1 = arith.constant 0 : i32
    return %c0_i32, %c0_i32_0 : i32, i32
  }
  func.func @transform_10(%arg0: i32) -> (i32, i32) {
    %c0_i32 = arith.constant 0 : i32
    %c0_i32_0 = arith.constant 0 : i32
    %c0_i32_1 = arith.constant 0 : i32
    return %c0_i32, %c0_i32_0 : i32, i32
  }
  func.func @transform_11(%arg0: i32) -> (i32, i32) {
    %c0_i32 = arith.constant 0 : i32
    %c0_i32_0 = arith.constant 0 : i32
    return %arg0, %c0_i32 : i32, i32
  }
}

</mosaic_0001>

<bundles_post_ra>
// kernel: tpu_custom_call.1
= control target key start
LH: loop header
LB: loop body
LE: loop exit
PB: predicated region body
PF: predicated region fallthrough
CT: control target
= control target key end

     0   :  { %vm56_vm0 = vcmask 1045504   ;;  %v514_v0 = vmov 0.0   ;;  %vm104_vm1 = vcmask 1043456   ;;  %vm515_vm2 = vmmov 0   ;;  %s661_s0 = inlined_call_operand.vmem [shape: f32[4,8], index: 0, kind: input, shape index: {}]   ;;  %s662_s1 = inlined_call_operand.vmem [shape: f32[4,12], index: 1, kind: input, shape index: {}]   ;;  %s663_s2 = inlined_call_operand.vmem [shape: f32[4,16], index: 2, kind: input, shape index: {}]   ;;  %s664_s3 = inlined_call_operand.vmem [shape: bf16[8,96], index: 3, kind: input, shape index: {}]   ;;  %s665_s4 = inlined_call_operand.vmem [shape: bf16[12,96], index: 4, kind: input, shape index: {}]   ;;  %s666_s5 = inlined_call_operand.vmem [shape: bf16[16,96], index: 5, kind: input, shape index: {}]   ;;  %s667_s6 = inlined_call_operand.vmem [shape: f32[1,96], index: 6, kind: input, shape index: {}]   ;;  %s668_s7 = inlined_call_operand.vmem [shape: bf16[96,32], index: 7, kind: input, shape index: {}]   ;;  %s669_s8 = inlined_call_operand.vmem [shape: f32[1,32], index: 8, kind: input, shape index: {}]   ;;  %s670_s9 = inlined_call_operand.vmem [shape: bf16[32,128], index: 9, kind: input, shape index: {}]   ;;  %s671_s10 = inlined_call_operand.vmem [shape: f32[1,128], index: 10, kind: input, shape index: {}]   ;;  %s672_s11 = inlined_call_operand.hbm [shape: bf16[4,128], index: 11, kind: output, shape index: {}]  }
   0x1   :  { %431 = vmatprep.subr.bf16.mxu0 %v514_v0  ;;  %v476_v1 = vld [vmem:[%s665_s4] sm:$0x3f]   ;;  %437 = vmatprep.subr.bf16.mxu1 %v514_v0  ;;  %vm100_vm3 = vcmask 64512   ;;  %vm52_vm4 = vcmask 97280  }
   0x2   :  { %v42_v2 = vld [vmem:[%s664_s3] sm:$0xf]  ;;  %433 = vmatprep.mubr.msk.bf16.mxu0 %vm515_vm2, %v514_v0  ;;  %439 = vmatprep.mubr.msk.bf16.mxu1 %vm515_vm2, %v514_v0  ;;  %v58_v6 = vsel %vm56_vm0, %v476_v1, 0 }
   0x3   :  { %v106_v3 = vsel %vm104_vm1, %v42_v2, 0  ;;  %v43_v4 = vld [vmem:[%s662_s1] sm:$0xf]  ;;  %432 = vmatpush3.bf16.msra.mxu0 %v58_v6 }
   0x4   :  { %v40_v5 = vld [vmem:[%s661_s0] sm:$0xf]  ;;  %438 = vmatpush3.bf16.msra.mxu1 %v106_v3  ;;  %v44_v7 = vpack.c.bf16 %v43_v4, %v43_v4  ;;  %443 = vmatprep.subr.bf16.mxu0 %v514_v0 }
   0x5   :  { %v41_v8 = vpack.c.bf16 %v40_v5, %v40_v5  ;;  %v477_v9 = vld [vmem:[%s666_s5] sm:$0xff]   ;;  %449 = vmatprep.subr.bf16.mxu1 %v514_v0 }
   0x6   :  { %v148_v10 = vld [vmem:[%s663_s2] sm:$0xf]  ;;  %434 = vmatmul.mubr.msk.bf16.vlgmr.msra.gmra.mrb[0].mxu0 %vm52_vm4, %v44_v7 }
   0x7   :  { %440 = vmatmul.mubr.msk.bf16.vlgmr.msra.gmra.mrb[0].mxu1 %vm100_vm3, %v41_v8  ;;  %444 = vmatpush3.bf16.msra.mxu0 %v477_v9 }
   0x8   :  { %461 = vmatprep.mubr.msk.bf16.mxu1 %vm515_vm2, %v514_v0  ;;  %445 = vmatprep.mubr.msk.bf16.mxu0 %vm515_vm2, %v514_v0 }
   0x9   :  { %465 = vmatprep.subr.bf16.mxu0 %v514_v0 }
   0xa   :  { %16 = vsyncpa [#allocation3], 0  ;;  %v149_v11 = vpack.c.bf16 %v148_v10, %v148_v10  ;;  %vm158_vm5 = vcmask 130048   ;;  %v478_v12 = vld [vmem:[%s668_s7] sm:$0xff]   ;;  %v479_v13 = vld [vmem:[%s668_s7 + $0x8] sm:$0xff]   ;;  %vm268_vm6 = vcmask 785408  }
   0xb   :  { %450 = vmatpush3.bf16.msra.mxu1 %v478_v12  ;;  %v480_v14 = vld [vmem:[%s668_s7 + $0x10] sm:$0xff]   ;;  %v481_v15 = vld [vmem:[%s668_s7 + $0x18] sm:$0xff]   ;;  %v482_v16 = vld [vmem:[%s668_s7 + $0x20] sm:$0xff]   ;;  %vm337_vm7 = vcmask 261120  }
   0xc   :  { %451 = vmatprep.subr.bf16.mxu1 %v514_v0  ;;  %v483_v17 = vld [vmem:[%s668_s7 + $0x28] sm:$0xff]   ;;  %v402_v28 = vld [vmem:[%s667_s6] ss:$0 sm:$0xff] }
   0xd   :  { %v484_v36 = vld [vmem:[%s670_s9] sm:$0xff]   ;;  %v485_v37 = vld [vmem:[%s670_s9 + $0x8] sm:$0xff]   ;;  %s516_s9 = smov [#allocation2]  }
   0xe   :  { %446 = vmatmul.mubr.msk.bf16.vlgmr.msra.gmra.mrb[4].mxu0 %vm158_vm5, %v149_v11  ;;  %v403_v38 = vld [vmem:[%s669_s8] ss:$0 sm:$0xff]  ;;  %s389_s23 = sshll.u32 %s516_s9, 4  ;;  %s390_s23 = int_to_ptr.vmem [resolvable:$true] %s389_s23 }
   0xf   :  { %469 = vmatprep.mubr.msk.bf16.mxu0 %vm515_vm2, %v514_v0  ;;  %452 = vmatpush3.bf16.msra.mxu1 %v479_v13  ;;  %v411_v46 = vld [vmem:[%s671_s10] ss:$0 sm:$0xff]  ;;  %s490_s8 = scalar_lea.vmem %s390_s23, 32  ;;  %p495_p1 = scmp.lt.s32.totalorder %s390_s23, %s390_s23 }
  0x10   :  { %453 = vmatprep.subr.bf16.mxu1 %v514_v0  ;;  %466 = vmatpush3.bf16.msra.mxu0 %v484_v36  ;;  %p491_p0 = scmp.ne.s32.totalorder %s390_s23, %s490_s8  ;;  %p496_p2 = scmp.lt.s32.totalorder %s490_s8, %s490_s8 }
  0x11   :  { %467 = vmatprep.subr.bf16.mxu0 %v514_v0 }
  0x12   :  { %p497_p3 = por %p496_p2, %p495_p1 }
  0x13   :  { %454 = vmatpush3.bf16.msra.mxu1 %v480_v14 }
  0x14   :  { %455 = vmatprep.subr.bf16.mxu1 %v514_v0  ;;  %468 = vmatpush3.bf16.msra.mxu0 %v485_v37  ;;  %p498_p4 = pnand %p497_p3, %p491_p0 }
  0x17   :  { %456 = vmatpush3.bf16.msra.mxu1 %v481_v15 }
  0x18   :  { %457 = vmatprep.subr.bf16.mxu1 %v514_v0 }
  0x1b   :  { %458 = vmatpush3.bf16.msra.mxu1 %v482_v16 }
  0x1c   :  { %459 = vmatprep.subr.bf16.mxu1 %v514_v0 }
  0x1f   :  { %460 = vmatpush3.bf16.msra.mxu1 %v483_v17 }
  0xd9   :  { %v94_v19 = vpop.f32.mrb[0].mxu0 }
  0xda   :  { %v142_v18 = vpop.f32.mrb[0].mxu1  ;;  %v435_v21 = vpop.f32.mrb[1].mxu0 }
  0xdb   :  { %v441_v20 = vpop.f32.mrb[1].mxu1  ;;  %v143_v22 = vadd.f32 %v142_v18, %v94_v19  ;;  %v97_v24 = vpop.f32.mrb[2].mxu0 }
  0xdc   :  { %v145_v23 = vpop.f32.mrb[2].mxu1  ;;  %v436_v26 = vpop.f32.mrb[3].mxu0 }
  0xdd   :  { %v442_v25 = vpop.f32.mrb[3].mxu1 }
  0xe1   :  { %v196_v27 = vpop.f32.mrb[4].mxu0 }
  0xe2   :  { %v202_v29 = vadd.f32 %v196_v27, %v143_v22  ;;  %v447_v30 = vpop.f32.mrb[5].mxu0 }
  0xe3   :  { %v199_v31 = vpop.f32.mrb[6].mxu0 }
  0xe4   :  { %v210_v32 = vadd.f32 %v402_v28, %v202_v29  ;;  %v448_v33 = vpop.f32.mrb[7].mxu0 }
  0xe6   :  { %v211_v34 = vpack.c.bf16 %v210_v32, %v210_v32 }
  0xe8   :  { %486 = vtanh.bf16 %v211_v34 }
  0xf3   :  { %v487_v35 = vpop.eup %486 }
  0xf4   :  { %462 = vmatmul.mubr.msk.bf16.vlgmr.msra.gmra.mrb[4].mxu1 %vm268_vm6, %v487_v35 }
 0x1c7   :  { %v306_v39 = vpop.f32.mrb[4].mxu1 }
 0x1c8   :  { %v307_v40 = vadd.f32 %v403_v38, %v306_v39  ;;  %v463_v41 = vpop.f32.mrb[5].mxu1 }
 0x1c9   :  { %v309_v42 = vpop.f32.mrb[6].mxu1 }
 0x1ca   :  { %v312_v43 = vpack.c.bf16 %v307_v40, %v307_v40  ;;  %v464_v44 = vpop.f32.mrb[7].mxu1 }
 0x1cc   :  { %488 = vtanh.bf16 %v312_v43 }
 0x1d7   :  { %v489_v45 = vpop.eup %488 }
 0x1d8   :  { %470 = vmatmul.mubr.msk.bf16.vlgmr.msra.gmra.mrb[8].mxu0 %vm337_vm7, %v489_v45 }
 0x2ab   :  { %v375_v47 = vpop.f32.mrb[8].mxu0 }
 0x2ac   :  { %v376_v48 = vadd.f32 %v411_v46, %v375_v47  ;;  %v471_v49 = vpop.f32.mrb[9].mxu0 }
 0x2ad   :  { %v378_v50 = vpop.f32.mrb[10].mxu0 }
 0x2ae   :  { %v381_v51 = vpack.c.bf16 %v376_v48, %v376_v48  ;;  %v472_v52 = vpop.f32.mrb[11].mxu0 }
 0x2b0   :  { %382 = vst [vmem:[#allocation2] sm:$0x3] %v381_v51 }
 0x2b1   :  { %501 = shalt.err (!%p498_p4)
}
 0x2b2   :  { %s502_s10 = scalar_lea.hbm %s672_s11, 32 }
 0x2b3   :  { %p503_p5 = scmp.ne.s32.totalorder %s672_s11, %s502_s10  ;;  %p506_p6 = scmp.lt.u32.totalorder %s502_s10, %s672_s11 }
 0x2b5   :  { %p508_p7 = pnand %p506_p6, %p503_p5 }
 0x2b7   :  { %511 = shalt.err (!%p508_p7)
}
 0x2b8   :  { %392 = dma.vmem_to_hbm [thread:$0]  %s390_s23, 32, %s672_s11, [#allocation3]  }
 0x2b9   :  { %512 = dma.done.wait [#allocation3], 32  }
 0x2ba   :  { %513 = vsyncadd [#allocation3], 4294967264 }
 0x2bb   :  { %396 = vsyncpa [#allocation3], 1 }

</bundles_post_ra>
